<compile_context>
chip_gen: v6e
topology: v6e:2x2x1
jax: 0.10.0
libtpu: 0.0.40
codegen_flags: <defaults>
</compile_context>

<pallas_src>
import functools

import jax
import jax.numpy as jnp
from jax.experimental import pallas as pl
from jax.experimental.pallas import tpu as pltpu


def _round_up(a, b):
    return ((a + b - 1) // b) * b


# ----------------------------------------------------------------------------
# Kernel: full residual block on a [tile_m, input_dim] row tile.
# ----------------------------------------------------------------------------
def _res_block_kernel(x_ref, w1_ref, b1_ref, w2_ref, b2_ref, o_ref,
                      *, depth, matmul_dtype):
    # f32 accumulator; `depth` is a compile-time constant -> static unroll.
    h = x_ref[...].astype(jnp.float32)
    for d in range(depth):
        h1 = jnp.dot(h.astype(matmul_dtype), w1_ref[d],
                     preferred_element_type=jnp.float32) + b1_ref[d]
        h1 = jnp.maximum(h1, 0.0)                      # ReLU (f32 on the VPU)
        h = jnp.dot(h1.astype(matmul_dtype), w2_ref[d],
                    preferred_element_type=jnp.float32) + b2_ref[d]
    # Identity shortcut: re-read the x tile (still resident in its pipeline
    # buffer) rather than keeping it live across the whole depth loop.
    o_ref[...] = (h + x_ref[...].astype(jnp.float32)).astype(o_ref.dtype)


# ----------------------------------------------------------------------------
# Wrapper
# ----------------------------------------------------------------------------
def res_block_forward(params, x, *, block_rows=256, matmul_dtype=jnp.bfloat16):
    """Apply resBlock to x of shape [..., input_dim]."""
    w1, b1, w2, b2 = params["w1"], params["b1"], params["w2"], params["b2"]
    depth, in_dim, width = w1.shape
    orig_shape = x.shape
    assert orig_shape[-1] == in_dim

    m = 1
    for s in orig_shape[:-1]:
        m *= s
    # Keep activations in their original dtype (no forced-f32 HBM traffic).
    x2 = x.reshape(m, in_dim)
    out_dtype = x2.dtype

    # Zero-pad the hidden width to a lane-dense multiple of 128 (weights only).
    # Padded w1 cols are 0 -> ReLU(0)=0 -> multiplied by padded (zero) w2 rows,
    # so the result is bit-identical in intent; x/out are untouched.
    w_pad = _round_up(width, 128)
    if w_pad != width:
        w1 = jnp.pad(w1, ((0, 0), (0, 0), (0, w_pad - width)))
        b1 = jnp.pad(b1, ((0, 0), (0, 0), (0, w_pad - width)))
        w2 = jnp.pad(w2, ((0, 0), (0, w_pad - width), (0, 0)))

    # Cast matmul operands (weights) to the MXU-native dtype once, here.
    # Biases stay f32: they are added to the f32 accumulator.
    w1 = w1.astype(matmul_dtype)
    w2 = w2.astype(matmul_dtype)
    b1 = b1.astype(jnp.float32)
    b2 = b2.astype(jnp.float32)

    # Row tiling: multiple of the sublane count, capped at block_rows, and
    # sized for >= 2 tiles when possible so "parallel" can shard across the
    # two v7x TensorCores.  No explicit padding: Pallas masks the ragged last
    # block and rows are independent, so padded rows are never observed.
    sub = 16 if out_dtype == jnp.bfloat16 else 8
    tile_m = min(block_rows, max(sub, _round_up(pl.cdiv(m, 2), sub)))
    grid = (pl.cdiv(m, tile_m),)

    def const3(i):                 # whole stacked weight tensor, resident in VMEM
        return (0, 0, 0)

    # VMEM budget: single-buffered weights + double-buffered x/out tiles +
    # f32 working set, with headroom; clamped to [32 MiB, 64 MiB].
    act_itemsize = jnp.dtype(out_dtype).itemsize
    w_bytes = ((w1.size + w2.size) * jnp.dtype(matmul_dtype).itemsize
               + (b1.size + b2.size) * 4)
    a_bytes = 2 * 2 * tile_m * in_dim * act_itemsize        # x + out, 2-buffered
    k_bytes = 4 * tile_m * max(in_dim, w_pad) * 4            # f32 temporaries
    vmem_limit = int(1.5 * (w_bytes + a_bytes + k_bytes))
    vmem_limit = min(max(vmem_limit, 32 * 1024 * 1024), 64 * 1024 * 1024)

    kernel = functools.partial(_res_block_kernel,
                               depth=depth, matmul_dtype=matmul_dtype)

    out = pl.pallas_call(
        kernel,
        out_shape=jax.ShapeDtypeStruct((m, in_dim), out_dtype),
        grid=grid,
        in_specs=[
            pl.BlockSpec((tile_m, in_dim), lambda i: (i, 0)),           # x rows
            # Constant-index weights/biases: single pipeline buffer (loaded once).
            pl.BlockSpec(w1.shape, const3, pipeline_mode=pl.Buffered(1)),
            pl.BlockSpec(b1.shape, const3, pipeline_mode=pl.Buffered(1)),
            pl.BlockSpec(w2.shape, const3, pipeline_mode=pl.Buffered(1)),
            pl.BlockSpec(b2.shape, const3, pipeline_mode=pl.Buffered(1)),
        ],
        out_specs=pl.BlockSpec((tile_m, in_dim), lambda i: (i, 0)),
        compiler_params=pltpu.CompilerParams(
            dimension_semantics=("parallel",),       # v7x: row tiles across both TCs
            vmem_limit_bytes=vmem_limit),
    )(x2, w1, b1, w2, b2)

    return out.reshape(orig_shape)


# ----------------------------------------------------------------------------
# Pure-JAX reference (mirrors the PyTorch Sequential exactly, f32 throughout)
# ----------------------------------------------------------------------------
def res_block_reference(params, x):
    w1, b1, w2, b2 = params["w1"], params["b1"], params["w2"], params["b2"]
    depth = w1.shape[0]
    h = x
    for d in range(depth):
        h1 = jnp.maximum(h @ w1[d] + b1[d], 0.0)
        h = h1 @ w2[d] + b2[d]
    return h + x


# ----------------------------------------------------------------------------
# Parameter init: weights stored [in, out] (transpose of nn.Linear.weight),
# stacked along a leading `depth` axis.
# ----------------------------------------------------------------------------
def init_params(key, input_dim, depth, width):
    keys = jax.random.split(key, 4 * depth)
    s1 = 1.0 / jnp.sqrt(jnp.float32(input_dim))
    s2 = 1.0 / jnp.sqrt(jnp.float32(width))
    w1 = jnp.stack([s1 * jax.random.normal(keys[4 * d + 0], (input_dim, width), jnp.float32)
                    for d in range(depth)])
    b1 = jnp.stack([s1 * jax.random.normal(keys[4 * d + 1], (1, width), jnp.float32)
                    for d in range(depth)])
    w2 = jnp.stack([s2 * jax.random.normal(keys[4 * d + 2], (width, input_dim), jnp.float32)
                    for d in range(depth)])
    b2 = jnp.stack([s2 * jax.random.normal(keys[4 * d + 3], (1, input_dim), jnp.float32)
                    for d in range(depth)])
    return {"w1": w1, "b1": b1, "w2": w2, "b2": b2}


if __name__ == "__main__":
    BATCH = 16
    INPUT_DIM = 32
    DEPTH = 2
    WIDTH = 64

    key = jax.random.PRNGKey(0)
    kx, kp = jax.random.split(key)

    x = jax.random.normal(kx, (BATCH, INPUT_DIM), dtype=jnp.float32)
    params = init_params(kp, INPUT_DIM, DEPTH, WIDTH)

    out = jax.jit(res_block_forward)(params, x)
    out = jax.block_until_ready(out)

    ref = res_block_reference(params, x)

    assert out.shape == (BATCH, INPUT_DIM)
    assert bool(jnp.all(jnp.isfinite(out)))
    # bf16 matmul operands (f32 accumulation) vs f32 reference -> loose tolerance.
    assert bool(jnp.allclose(out, ref, rtol=5e-2, atol=5e-2))
    print("KERNEL_OK")
</pallas_src>

<mosaic_0001>
module attributes {stable_mosaic.version = 11 : i64} {
  func.func @_res_block_kernel(%arg0: i32, %arg1: memref<8x32xf32, #tpu.memory_space<vmem>>, %arg2: memref<2x32x128xbf16, #tpu.memory_space<vmem>>, %arg3: memref<2x1x128xf32, #tpu.memory_space<vmem>>, %arg4: memref<2x128x32xbf16, #tpu.memory_space<vmem>>, %arg5: memref<2x1x32xf32, #tpu.memory_space<vmem>>, %arg6: memref<8x32xf32, #tpu.memory_space<vmem>>) attributes {dimension_semantics = [#tpu.dimension_semantics<parallel>], iteration_bounds = array<i64: 2>, scalar_prefetch = 0 : i64, scratch_operands = 0 : i64, tpu.core_type = #tpu.core_type<tc>, window_params = [{transform_indices = @transform_0, window_bounds = array<i64: 8, 32>}, {pipeline_mode = #tpu.pipeline_mode<synchronous>, transform_indices = @transform_1, window_bounds = array<i64: 2, 32, 128>}, {pipeline_mode = #tpu.pipeline_mode<synchronous>, transform_indices = @transform_2, window_bounds = array<i64: 2, 1, 128>}, {pipeline_mode = #tpu.pipeline_mode<synchronous>, transform_indices = @transform_3, window_bounds = array<i64: 2, 128, 32>}, {pipeline_mode = #tpu.pipeline_mode<synchronous>, transform_indices = @transform_4, window_bounds = array<i64: 2, 1, 32>}, {transform_indices = @transform_5, window_bounds = array<i64: 8, 32>}]} {
    %c0 = arith.constant 0 : index
    %c0_0 = arith.constant 0 : index
    %0 = vector.load %arg1[%c0, %c0_0] : memref<8x32xf32, #tpu.memory_space<vmem>>, vector<8x32xf32>
    %1 = arith.truncf %0 : vector<8x32xf32> to vector<8x32xbf16>
    %c0_1 = arith.constant 0 : index
    %c0_2 = arith.constant 0 : index
    %c0_3 = arith.constant 0 : index
    %2 = vector.load %arg2[%c0_1, %c0_2, %c0_3] : memref<2x32x128xbf16, #tpu.memory_space<vmem>>, vector<1x32x128xbf16>
    %3 = vector.shape_cast %2 : vector<1x32x128xbf16> to vector<32x128xbf16>
    %cst = arith.constant dense<0.000000e+00> : vector<8x128xf32>
    %4 = tpu.matmul %1, %3, %cst {dimension_numbers = #tpu.dot_dimension_numbers<[1], [0], [0], [1], [0, 0, 1, 1], [], []>} : vector<8x32xbf16>, vector<32x128xbf16>, vector<8x128xf32> -> vector<8x128xf32>
    %c0_4 = arith.constant 0 : index
    %c0_5 = arith.constant 0 : index
    %c0_6 = arith.constant 0 : index
    %5 = vector.load %arg3[%c0_4, %c0_5, %c0_6] : memref<2x1x128xf32, #tpu.memory_space<vmem>>, vector<1x1x128xf32>
    %6 = vector.shape_cast %5 : vector<1x1x128xf32> to vector<1x128xf32>
    %7 = vector.broadcast %6 : vector<1x128xf32> to vector<8x128xf32>
    %8 = arith.addf %4, %7 : vector<8x128xf32>
    %cst_7 = arith.constant 0.000000e+00 : f32
    %9 = vector.broadcast %cst_7 : f32 to vector<8x128xf32>
    %10 = arith.maximumf %8, %9 : vector<8x128xf32>
    %11 = arith.truncf %10 : vector<8x128xf32> to vector<8x128xbf16>
    %c0_8 = arith.constant 0 : index
    %c0_9 = arith.constant 0 : index
    %c0_10 = arith.constant 0 : index
    %12 = vector.load %arg4[%c0_8, %c0_9, %c0_10] : memref<2x128x32xbf16, #tpu.memory_space<vmem>>, vector<1x128x32xbf16>
    %13 = vector.shape_cast %12 : vector<1x128x32xbf16> to vector<128x32xbf16>
    %cst_11 = arith.constant dense<0.000000e+00> : vector<8x32xf32>
    %14 = tpu.matmul %11, %13, %cst_11 {dimension_numbers = #tpu.dot_dimension_numbers<[1], [0], [0], [1], [0, 0, 1, 1], [], []>} : vector<8x128xbf16>, vector<128x32xbf16>, vector<8x32xf32> -> vector<8x32xf32>
    %c0_12 = arith.constant 0 : index
    %c0_13 = arith.constant 0 : index
    %c0_14 = arith.constant 0 : index
    %15 = vector.load %arg5[%c0_12, %c0_13, %c0_14] : memref<2x1x32xf32, #tpu.memory_space<vmem>>, vector<1x1x32xf32>
    %16 = vector.shape_cast %15 : vector<1x1x32xf32> to vector<1x32xf32>
    %17 = vector.broadcast %16 : vector<1x32xf32> to vector<8x32xf32>
    %18 = arith.addf %14, %17 : vector<8x32xf32>
    %19 = arith.truncf %18 : vector<8x32xf32> to vector<8x32xbf16>
    %c1 = arith.constant 1 : index
    %c0_15 = arith.constant 0 : index
    %c0_16 = arith.constant 0 : index
    %20 = vector.load %arg2[%c1, %c0_15, %c0_16] : memref<2x32x128xbf16, #tpu.memory_space<vmem>>, vector<1x32x128xbf16>
    %21 = vector.shape_cast %20 : vector<1x32x128xbf16> to vector<32x128xbf16>
    %cst_17 = arith.constant dense<0.000000e+00> : vector<8x128xf32>
    %22 = tpu.matmul %19, %21, %cst_17 {dimension_numbers = #tpu.dot_dimension_numbers<[1], [0], [0], [1], [0, 0, 1, 1], [], []>} : vector<8x32xbf16>, vector<32x128xbf16>, vector<8x128xf32> -> vector<8x128xf32>
    %c1_18 = arith.constant 1 : index
    %c0_19 = arith.constant 0 : index
    %c0_20 = arith.constant 0 : index
    %23 = vector.load %arg3[%c1_18, %c0_19, %c0_20] : memref<2x1x128xf32, #tpu.memory_space<vmem>>, vector<1x1x128xf32>
    %24 = vector.shape_cast %23 : vector<1x1x128xf32> to vector<1x128xf32>
    %25 = vector.broadcast %24 : vector<1x128xf32> to vector<8x128xf32>
    %26 = arith.addf %22, %25 : vector<8x128xf32>
    %cst_21 = arith.constant 0.000000e+00 : f32
    %27 = vector.broadcast %cst_21 : f32 to vector<8x128xf32>
    %28 = arith.maximumf %26, %27 : vector<8x128xf32>
    %29 = arith.truncf %28 : vector<8x128xf32> to vector<8x128xbf16>
    %c1_22 = arith.constant 1 : index
    %c0_23 = arith.constant 0 : index
    %c0_24 = arith.constant 0 : index
    %30 = vector.load %arg4[%c1_22, %c0_23, %c0_24] : memref<2x128x32xbf16, #tpu.memory_space<vmem>>, vector<1x128x32xbf16>
    %31 = vector.shape_cast %30 : vector<1x128x32xbf16> to vector<128x32xbf16>
    %cst_25 = arith.constant dense<0.000000e+00> : vector<8x32xf32>
    %32 = tpu.matmul %29, %31, %cst_25 {dimension_numbers = #tpu.dot_dimension_numbers<[1], [0], [0], [1], [0, 0, 1, 1], [], []>} : vector<8x128xbf16>, vector<128x32xbf16>, vector<8x32xf32> -> vector<8x32xf32>
    %c1_26 = arith.constant 1 : index
    %c0_27 = arith.constant 0 : index
    %c0_28 = arith.constant 0 : index
    %33 = vector.load %arg5[%c1_26, %c0_27, %c0_28] : memref<2x1x32xf32, #tpu.memory_space<vmem>>, vector<1x1x32xf32>
    %34 = vector.shape_cast %33 : vector<1x1x32xf32> to vector<1x32xf32>
    %35 = vector.broadcast %34 : vector<1x32xf32> to vector<8x32xf32>
    %36 = arith.addf %32, %35 : vector<8x32xf32>
    %c0_29 = arith.constant 0 : index
    %c0_30 = arith.constant 0 : index
    %37 = vector.load %arg1[%c0_29, %c0_30] : memref<8x32xf32, #tpu.memory_space<vmem>>, vector<8x32xf32>
    %38 = arith.addf %36, %37 : vector<8x32xf32>
    %c0_31 = arith.constant 0 : index
    %c0_32 = arith.constant 0 : index
    %39 = vector.load %arg6[%c0_31, %c0_32] : memref<8x32xf32, #tpu.memory_space<vmem>>, vector<8x32xf32>
    tpu.vector_store %arg6[%c0_31, %c0_32], %38 {strides = array<i32>} : memref<8x32xf32, #tpu.memory_space<vmem>>, vector<8x32xf32>,
    return
  }
  func.func @transform_0(%arg0: i32) -> (i32, i32) {
    %c0_i32 = arith.constant 0 : i32
    %c0_i32_0 = arith.constant 0 : i32
    return %arg0, %c0_i32 : i32, i32
  }
  func.func @transform_1(%arg0: i32) -> (i32, i32, i32) {
    %c0_i32 = arith.constant 0 : i32
    %c0_i32_0 = arith.constant 0 : i32
    %c0_i32_1 = arith.constant 0 : i32
    %c0_i32_2 = arith.constant 0 : i32
    return %c0_i32, %c0_i32_0, %c0_i32_1 : i32, i32, i32
  }
  func.func @transform_2(%arg0: i32) -> (i32, i32, i32) {
    %c0_i32 = arith.constant 0 : i32
    %c0_i32_0 = arith.constant 0 : i32
    %c0_i32_1 = arith.constant 0 : i32
    %c0_i32_2 = arith.constant 0 : i32
    return %c0_i32, %c0_i32_0, %c0_i32_1 : i32, i32, i32
  }
  func.func @transform_3(%arg0: i32) -> (i32, i32, i32) {
    %c0_i32 = arith.constant 0 : i32
    %c0_i32_0 = arith.constant 0 : i32
    %c0_i32_1 = arith.constant 0 : i32
    %c0_i32_2 = arith.constant 0 : i32
    return %c0_i32, %c0_i32_0, %c0_i32_1 : i32, i32, i32
  }
  func.func @transform_4(%arg0: i32) -> (i32, i32, i32) {
    %c0_i32 = arith.constant 0 : i32
    %c0_i32_0 = arith.constant 0 : i32
    %c0_i32_1 = arith.constant 0 : i32
    %c0_i32_2 = arith.constant 0 : i32
    return %c0_i32, %c0_i32_0, %c0_i32_1 : i32, i32, i32
  }
  func.func @transform_5(%arg0: i32) -> (i32, i32) {
    %c0_i32 = arith.constant 0 : i32
    %c0_i32_0 = arith.constant 0 : i32
    return %arg0, %c0_i32 : i32, i32
  }
}

</mosaic_0001>

<bundles_post_ra>
// kernel: res_block_forward.1
= control target key start
LH: loop header
LB: loop body
LE: loop exit
PB: predicated region body
PF: predicated region fallthrough
CT: control target
= control target key end

     0   :  { %10 = vsyncpa [#allocation3], 0  ;;  %s1163_s0 = inlined_call_operand.vmem [shape: f32[16,32], index: 0, kind: input, shape index: {}]   ;;  %s1164_s1 = inlined_call_operand.vmem [shape: bf16[2,32,128], index: 1, kind: input, shape index: {}]   ;;  %s1165_s2 = inlined_call_operand.vmem [shape: f32[2,1,128], index: 2, kind: input, shape index: {}]   ;;  %s1166_s3 = inlined_call_operand.vmem [shape: bf16[2,128,32], index: 3, kind: input, shape index: {}]   ;;  %s1167_s4 = inlined_call_operand.vmem [shape: f32[2,1,32], index: 4, kind: input, shape index: {}]   ;;  %s1168_s5 = inlined_call_operand.hbm [shape: f32[16,32], index: 5, kind: output, shape index: {}]  }
   0x1   :  { %12 = vsyncpa [#allocation3 + $0x1], 0  ;;  %s956_s18 = smov 0   ;;  %s958_s19 = smov 0  }
   0x2   :  { %s960_s20 = smov 0   ;;  %s962_s21 = smov 0  }
   0x3 LB: > { %s977_s22 = sadd.s32 4294967295, %s921_s21   ;;  %s662_s23 = sadd.s32 4294967294, %s921_s21   ;;  %s921_s21 = sphi %s962_s21, %s1174_s21   ;;  %s917_s20 = sphi %s960_s20, %s1173_s20   ;;  %s913_s19 = sphi %s958_s19, %s1172_s19   ;;  %s909_s18 = sphi %s956_s18, %s1171_s18  }
   0x4   : > { %s981_s24 = sadd.s32 1, %s921_s21   ;;  %s135_s25 = sadd.s32 1, %s917_s20 }
   0x5   : > { %s132_s26 = ssub.s32 %s921_s21, %s981_s24  ;;  %p145_p0 = scmp.ne.s32.totalorder %s917_s20, %s913_s19 }
   0x6   : > { %p133_p1 = scmp.eq.s32.totalorder %s132_s26, 0  ;;  %p146_p2 = scmp.eq.s32.totalorder %s977_s22, 1 }
   0x7   : > { %p151_p3 = scmp.ne.s32.totalorder %s913_s19, %s909_s18  ;;  %p152_p4 = scmp.eq.s32.totalorder %s662_s23, 1 }
   0x8   : > { %s992_s27 = scalar_select %p133_p1, %s917_s20, %s135_s25  }
   0x9   : > { %p994_p5 = por %p146_p2, %p145_p0  ;;  %p998_p6 = por %p152_p4, %p151_p3 }
   0xa   : > { %p665_p7 = scmp.ge.s32.totalorder %s921_s21, 1  ;;  %p189_p8 = scmp.lt.s32.totalorder %s921_s21, 3 }
   0xc   : > { %p190_p9 = pnand %p665_p7, %p189_p8 }
   0xd   : > { %p216_p10 = scmp.lt.s32.totalorder (!%p190_p9), %s977_s22, 1  ;;  %s213_s8 = sand.u32 (!%p190_p9), 1, %s913_s19  }
   0xe   : > { %193 = sbr.rel (%p190_p9) target bundleno = 834 (0x342), region = 40  ;;  %s717_s12 = sshll.u32 (!%p190_p9), %s977_s22, 7 }
   0xf   : > { %s1121_s17 = scalar_lea.hbm (!%p190_p9), %s1168_s5, %s717_s12  ;;  %s925_s25 = smov (!%p190_p9), [#allocation2]  }
  0x10   : > { %s865_s26 = sshll.u32 (!%p190_p9), %s925_s25, 4  ;;  %s866_s26 = int_to_ptr.vmem [resolvable:$false] %s865_s26 }
  0x11   : > { %s867_s30 = scalar_lea.vmem (!%p190_p9), %s866_s26, 256 }
  0x13   : > { %v841_v0 = vld [vmem:[%s1164_s1 + $0x8] sm:$0xff]   ;;  %v923_v1 = vmov 0.0   ;;  %v842_v2 = vld [vmem:[%s1164_s1] sm:$0xff]   ;;  %vm924_vm0 = vmmov 0   ;;  %s217_s9 = scalar_select %p216_p10, %s977_s22, 1  ;;  %vm246_vm1 = vcmask 261120  }
  0x14   : > { %744 = vmatprep.subr.bf16.mxu1 %v923_v1  ;;  %772 = vmatprep.subr.bf16.mxu0 %v923_v1  ;;  %v843_v4 = vld [vmem:[%s1166_s3 + $0x38] sm:$0xff]   ;;  %v844_v6 = vld [vmem:[%s1166_s3 + $0x30] sm:$0xff]   ;;  %v845_v7 = vld [vmem:[%s1166_s3 + $0x28] sm:$0xff]   ;;  %s590_s22 = scalar_lea.sflag [#allocation3], %s213_s8 }
  0x15   : > { %745 = vmatpush3.bf16.msra.mxu1 %v841_v0  ;;  %748 = vmatprep.mubr.msk.bf16.mxu1 %vm924_vm0, %v923_v1  ;;  %s667_s10 = sshll.u32 %s217_s9, 3  ;;  %v846_v8 = vld [vmem:[%s1166_s3 + $0x20] sm:$0xff]   ;;  %v847_v9 = vld [vmem:[%s1166_s3 + $0x18] sm:$0xff]   ;;  %v848_v10 = vld [vmem:[%s1166_s3 + $0x10] sm:$0xff]   ;;  %s666_s9 = sshll.u32 %s213_s8, 3 }
  0x16   : > { %746 = vmatprep.subr.bf16.mxu1 %v923_v1  ;;  %776 = vmatprep.mubr.msk.bf16.mxu0 %vm924_vm0, %v923_v1  ;;  %s219_s13 = scalar_lea.vmem %s1163_s0, %s667_s10  ;;  %v849_v11 = vld [vmem:[%s1166_s3 + $0x8] sm:$0xff]   ;;  %v850_v12 = vld [vmem:[%s1166_s3] sm:$0xff]   ;;  %v851_v13 = vld [vmem:[%s1164_s1 + $0x18] sm:$0xff]  }
  0x17   : > { %v1023_v3 = vld [vmem:[%s219_s13] sm:$0xff]  ;;  %773 = vmatpush3.bf16.msra.mxu0 %v851_v13  ;;  %v852_v22 = vld [vmem:[%s1164_s1 + $0x10] sm:$0xff]   ;;  %v853_v27 = vld [vmem:[%s1166_s3 + $0x78] sm:$0xff]   ;;  %s215_s13 = scalar_lea.vmem [#allocation2], %s666_s9 }
  0x18   : > { %v222_v5 = vpack.c.bf16 %v1023_v3, %v1023_v3  ;;  %774 = vmatprep.subr.bf16.mxu0 %v923_v1  ;;  %v668_v14 = vld [vmem:[%s1165_s2] ss:$0 sm:$0xff]  ;;  %v854_v31 = vld [vmem:[%s1166_s3 + $0x70] sm:$0xff]   ;;  %v855_v32 = vld [vmem:[%s1166_s3 + $0x68] sm:$0xff]   ;;  %s603_s14 = sshll.u32 %s215_s13, 4  ;;  %s1123_s14 = int_to_ptr.vmem [resolvable:$true] %s603_s14 }
  0x19   : > { %747 = vmatpush3.bf16.msra.mxu1 %v842_v2  ;;  %v672_v23 = vld [vmem:[%s1167_s4] ss:$0 sm:$0xff]  ;;  %v857_v34 = vld [vmem:[%s1166_s3 + $0x58] sm:$0xff]   ;;  %v858_v35 = vld [vmem:[%s1166_s3 + $0x50] sm:$0xff]   ;;  %s861_s23 = scalar_lea.vmem %s1123_s14, 128  ;;  %p868_p0 = scmp.lt.s32.totalorder %s1123_s14, %s866_s26 }
  0x1a   : > { %752 = vmatprep.subr.bf16.mxu1 %v923_v1  ;;  %v856_v33 = vld [vmem:[%s1166_s3 + $0x60] sm:$0xff]   ;;  %v859_v36 = vld [vmem:[%s1166_s3 + $0x48] sm:$0xff]   ;;  %p862_p11 = scmp.ne.s32.totalorder %s1123_s14, %s861_s23  ;;  %p869_p1 = scmp.lt.s32.totalorder %s867_s30, %s861_s23 }
  0x1b   : > { %775 = vmatpush3.bf16.msra.mxu0 %v852_v22  ;;  %v860_v37 = vld [vmem:[%s1166_s3 + $0x40] sm:$0xff]  }
  0x1c   : > { %749 = vmatmul.mubr.msk.bf16.vlgmr.msra.gmra.mxu1 %vm246_vm1, %v222_v5  ;;  %780 = vmatprep.subr.bf16.mxu0 %v923_v1  ;;  %v686_v38 = vld [vmem:[%s1165_s2 + $0x1] ss:$0 sm:$0xff]  ;;  %p863_p12 = pnand %p862_p11, %p994_p5  ;;  %p870_p2 = por %p869_p1, %p868_p0 }
  0x1d   : > { %753 = vmatpush3.bf16.msra.mxu1 %v843_v4  ;;  %768 = vmatprep.mubr.msk.bf16.mxu1 %vm924_vm0, %v923_v1  ;;  %v707_v46 = vld [vmem:[%s1167_s4 + $0x1] ss:$0 sm:$0xff] }
  0x1e   : > { %754 = vmatprep.subr.bf16.mxu1 %v923_v1  ;;  %p864_p13 = pneg %p863_p12 }
  0x20   : > { %p871_p3 = pnand %p870_p2, %p864_p13 }
  0x21   : > { %755 = vmatpush3.bf16.msra.mxu1 %v844_v6 }
  0x22   : > { %756 = vmatprep.subr.bf16.mxu1 %v923_v1 }
  0x25   : > { %757 = vmatpush3.bf16.msra.mxu1 %v845_v7 }
  0x26   : > { %758 = vmatprep.subr.bf16.mxu1 %v923_v1 }
  0x29   : > { %759 = vmatpush3.bf16.msra.mxu1 %v846_v8 }
  0x2a   : > { %760 = vmatprep.subr.bf16.mxu1 %v923_v1 }
  0x2d   : > { %761 = vmatpush3.bf16.msra.mxu1 %v847_v9 }
  0x2e   : > { %762 = vmatprep.subr.bf16.mxu1 %v923_v1 }
  0x31   : > { %763 = vmatpush3.bf16.msra.mxu1 %v848_v10 }
  0x32   : > { %764 = vmatprep.subr.bf16.mxu1 %v923_v1 }
  0x35   : > { %765 = vmatpush3.bf16.msra.mxu1 %v849_v11 }
  0x36   : > { %766 = vmatprep.subr.bf16.mxu1 %v923_v1 }
  0x39   : > { %767 = vmatpush3.bf16.msra.mxu1 %v850_v12 }
  0xdc   : > { %v284_v15 = vpop.f32.mrf.mxu1 }
  0xdd   : > { %v285_v16 = vadd.f32 %v668_v14, %v284_v15 }
  0xde   : > { %v750_v17 = vpop.f32.mrf.mxu1 }
  0xdf   : > { %v290_v18 = vmax.f32 %v285_v16, 0.0 }
  0xe0   : > { %v287_v19 = vpop.f32.mrf.mxu1 }
  0xe1   : > { %v291_v20 = vpack.c.bf16 %v290_v18, %v290_v18 }
  0xe2   : > { %v751_v21 = vpop.f32.mrf.mxu1 }
  0xe3   : > { %769 = vmatmul.mubr.bf16.vlgmr.msra.gmra.mxu1 %v291_v20 }
 0x1a3   : > { %v397_v24 = vpop.f32.mrf.mxu1 }
 0x1a4   : > { %v398_v25 = vadd.f32 %v672_v23, %v397_v24 }
 0x1a5   : > { %v770_v26 = vpop.f32.mrf.mxu1 }
 0x1a6   : > { %v403_v28 = vpack.c.bf16 %v398_v25, %v398_v25 }
 0x1a7   : > { %v400_v29 = vpop.f32.mrf.mxu1 }
 0x1a8   : > { %777 = vmatmul.mubr.msk.bf16.vlgmr.msra.gmra.mxu0 %vm246_vm1, %v403_v28 }
 0x1a9   : > { %v771_v30 = vpop.f32.mrf.mxu1  ;;  %781 = vmatpush3.bf16.msra.mxu0 %v853_v27  ;;  %796 = vmatprep.mubr.msk.bf16.mxu0 %vm924_vm0, %v923_v1 }
 0x1aa   : > { %782 = vmatprep.subr.bf16.mxu0 %v923_v1 }
 0x1ad   : > { %783 = vmatpush3.bf16.msra.mxu0 %v854_v31 }
 0x1ae   : > { %784 = vmatprep.subr.bf16.mxu0 %v923_v1 }
 0x1b1   : > { %785 = vmatpush3.bf16.msra.mxu0 %v855_v32 }
 0x1b2   : > { %786 = vmatprep.subr.bf16.mxu0 %v923_v1 }
 0x1b5   : > { %787 = vmatpush3.bf16.msra.mxu0 %v856_v33 }
 0x1b6   : > { %788 = vmatprep.subr.bf16.mxu0 %v923_v1 }
 0x1b9   : > { %789 = vmatpush3.bf16.msra.mxu0 %v857_v34 }
 0x1ba   : > { %790 = vmatprep.subr.bf16.mxu0 %v923_v1 }
 0x1bd   : > { %791 = vmatpush3.bf16.msra.mxu0 %v858_v35 }
 0x1be   : > { %792 = vmatprep.subr.bf16.mxu0 %v923_v1 }
 0x1c1   : > { %793 = vmatpush3.bf16.msra.mxu0 %v859_v36 }
 0x1c2   : > { %794 = vmatprep.subr.bf16.mxu0 %v923_v1 }
 0x1c5   : > { %795 = vmatpush3.bf16.msra.mxu0 %v860_v37 }
 0x268   : > { %v466_v39 = vpop.f32.mrf.mxu0 }
 0x269   : > { %v467_v40 = vadd.f32 %v686_v38, %v466_v39 }
 0x26a   : > { %v778_v41 = vpop.f32.mrf.mxu0 }
 0x26b   : > { %v472_v42 = vmax.f32 %v467_v40, 0.0 }
 0x26c   : > { %v469_v43 = vpop.f32.mrf.mxu0 }
 0x26d   : > { %v473_v44 = vpack.c.bf16 %v472_v42, %v472_v42 }
 0x26e   : > { %v779_v45 = vpop.f32.mrf.mxu0 }
 0x26f   : > { %797 = vmatmul.mubr.bf16.vlgmr.msra.gmra.mxu0 %v473_v44 }
 0x32f   : > { %v581_v47 = vpop.f32.mrf.mxu0 }
 0x330   : > { %v582_v48 = vadd.f32 %v707_v46, %v581_v47 }
 0x331   : > { %v798_v49 = vpop.f32.mrf.mxu0 }
 0x332   : > { %v587_v50 = vadd.f32 %v582_v48, %v1023_v3 }
 0x333   : > { %v584_v51 = vpop.f32.mrf.mxu0 }
 0x334   : > { %588 = vst.msk [vmem:[%s215_s13] sm:$0xff] %vm246_vm1, %v587_v50 }
 0x335   : > { %v799_v52 = vpop.f32.mrf.mxu0 }
 0x336   : > { %874 = shalt.err (!%p871_p3)
}
 0x337   : > { %s875_s6 = scalar_lea.hbm %s1121_s17, 128  ;;  %s879_s9 = scalar_lea.hbm %s1168_s5, 256 }
 0x338   : > { %p876_p4 = scmp.ne.s32.totalorder %s1121_s17, %s875_s6  ;;  %p880_p9 = scmp.lt.s32.totalorder %s1121_s17, %s1168_s5 }
 0x339   : > { %p881_p10 = scmp.lt.s32.totalorder %s879_s9, %s875_s6 }
 0x33a   : > { %p877_p7 = pnand %p876_p4, %p994_p5 }
 0x33b   : > { %p882_p11 = por %p881_p10, %p880_p9 }
 0x33c   : > { %p878_p8 = pneg %p877_p7 }
 0x33e   : > { %p883_p12 = pnand %p882_p11, %p878_p8 }
 0x340   : > { %886 = shalt.err (!%p883_p12)
}
 0x341   : > { %800 = dma.vmem_to_hbm [thread:$0]  (%p994_p5), %s1123_s14, 128, %s1121_s17, %s590_s22  }
 0x342 PF: > { %p806_p13 = scmp.ge.s32.totalorder %s921_s21, 2  ;;  %s615_s12 = sand.u32 1, %s909_s18  }
 0x343   : > { %s616_s13 = scalar_lea.sflag [#allocation3], %s615_s12 }
 0x344   : > { %p803_p0 = pnand %p806_p13, %p998_p6 }
 0x346   : > { %p804_p1 = pneg %p803_p0 }
 0x348   : > { %904 = dma.done.wait (%p804_p1), %s616_s13, 128  }
 0x349   : > { %906 = vsyncadd (%p804_p1), %s616_s13, 4294967168  ;;  %p15_p2 = scmp.ge.s32.totalorder %s981_s24, 4   ;;  %s1171_s18 = smov %s913_s19 }
 0x34a   : > { %s1172_s19 = smov %s917_s20  ;;  %s1173_s20 = smov %s992_s27 }
 0x34b   : > { %s1174_s21 = smov %s981_s24  ;;  %17 = sbr.rel (!%p15_p2) target bundleno = 3 (0x3), region = 79 }
 0x350   :  { %621 = vsyncpa [#allocation3], 1 }
 0x351   :  { %623 = vsyncpa [#allocation3 + $0x1], 1 }

</bundles_post_ra>
